<compile_context>
chip_gen: v6e
topology: v6e:2x2x1
jax: 0.10.0
libtpu: 0.0.40
codegen_flags: <defaults>
</compile_context>

<pallas_src>
import functools

import jax
import jax.numpy as jnp
from jax.experimental import pallas as pl
from jax.experimental.pallas import tpu as pltpu


def _round_up(x: int, m: int) -> int:
    return ((x + m - 1) // m) * m


def _pick_tile(dim: int, max_tile: int, align: int):
    """Largest tile that is a multiple of `align`, divides round_up(dim, align),
    and is <= max_tile.  Returns (tile, padded_dim)."""
    dp = _round_up(dim, align)
    if dp <= max_tile:
        return dp, dp
    best = align
    t = align
    while t <= max_tile:
        if dp % t == 0:
            best = t
        t += align
    return best, dp


def _linear_kernel(x_ref, w_ref, b_ref, o_ref):
    # x_ref: (tm, tk), w_ref: (tk, tn) [K-major weight], b_ref: (1, tn),
    # o_ref: (tm, tn) f32 -- used directly as the K-reduction accumulator.
    k = pl.program_id(2)

    partial = jax.lax.dot_general(
        x_ref[...],
        w_ref[...],
        dimension_numbers=(((1,), (0,)), ((), ())),
        preferred_element_type=jnp.float32,
    )

    @pl.when(k == 0)
    def _first():
        o_ref[...] = partial

    @pl.when(k > 0)
    def _accum():
        o_ref[...] += partial

    @pl.when(k == pl.num_programs(2) - 1)
    def _bias():
        # Bias added once per output tile, off the hot K loop, in f32.
        o_ref[...] += b_ref[...].astype(jnp.float32)


@functools.partial(
    jax.jit,
    static_argnames=("batch", "out_dim", "mp", "kp", "tm", "tn", "tk", "compute_dtype"),
)
def _linear_apply(x, w_kn, b_1n, *, batch, out_dim, mp, kp, tm, tn, tk, compute_dtype):
    B, d_in = x.shape
    np_ = w_kn.shape[1]

    x = x.astype(compute_dtype)
    # Static-shape branch: skip the activation pad when already aligned.
    if (mp, kp) != (B, d_in):
        x = jnp.pad(x, ((0, mp - B), (0, kp - d_in)))

    grid = (mp // tm, np_ // tn, kp // tk)

    itemsize = jnp.dtype(compute_dtype).itemsize
    cost = pl.CostEstimate(
        flops=2 * mp * np_ * kp,
        bytes_accessed=itemsize * (mp * kp + kp * np_) + 4 * mp * np_,
        transcendentals=0,
    )

    out_p = pl.pallas_call(
        _linear_kernel,
        out_shape=jax.ShapeDtypeStruct((mp, np_), jnp.float32),
        grid_spec=pltpu.PrefetchScalarGridSpec(
            num_scalar_prefetch=0,
            grid=grid,
            in_specs=[
                pl.BlockSpec((tm, tk), lambda i, j, k: (i, k)),   # x tile (M,K)
                pl.BlockSpec((tk, tn), lambda i, j, k: (k, j)),   # W tile (K,N), K-major
                pl.BlockSpec((1, tn), lambda i, j, k: (0, j)),    # bias tile
            ],
            out_specs=pl.BlockSpec((tm, tn), lambda i, j, k: (i, j)),
        ),
        compiler_params=pltpu.CompilerParams(
            dimension_semantics=("parallel", "parallel", "arbitrary"),
            vmem_limit_bytes=32 * 1024 * 1024,
        ),
        cost_estimate=cost,
    )(x, w_kn, b_1n)

    if (mp, np_) != (batch, out_dim):
        out_p = out_p[:batch, :out_dim]
    return out_p


class PallasLinear:
    """nn.Linear equivalent; pads/transposes parameters once at init."""

    def __init__(self, weight, bias, *, max_tm=512, max_tn=512, max_tk=1024,
                 compute_dtype=jnp.float32):
        d_out, d_in = weight.shape
        self.d_in, self.d_out = d_in, d_out
        self.max_tm = max_tm
        self.compute_dtype = compute_dtype

        # Tiles chosen so padding is at most one (8,128) tile per dim.
        self.tn, self.np_ = _pick_tile(d_out, max_tn, 128)
        self.tk, self.kp = _pick_tile(d_in, max_tk, 128)

        # One-time pad + transpose of the weight to K-major (Kp, Np); padded K
        # rows are zero so they contribute nothing to the accumulation.
        w_kn = jnp.zeros((self.kp, self.np_), compute_dtype)
        self.w_kn = w_kn.at[:d_in, :d_out].set(weight.T.astype(compute_dtype))
        # Bias kept in f32 (added in the f32 accumulator).
        self.b_1n = jnp.zeros((1, self.np_), jnp.float32).at[0, :d_out].set(
            bias.astype(jnp.float32)
        )

    def __call__(self, x):
        B, d_in = x.shape
        assert d_in == self.d_in, "input feature dim mismatch"
        # Sublane-native M alignment: 8 for f32 feed, 16 for bf16 feed.
        align_m = 8 if jnp.dtype(self.compute_dtype).itemsize == 4 else 16
        tm, mp = _pick_tile(B, self.max_tm, align_m)
        return _linear_apply(
            x, self.w_kn, self.b_1n,
            batch=B, out_dim=self.d_out, mp=mp, kp=self.kp,
            tm=tm, tn=self.tn, tk=self.tk, compute_dtype=self.compute_dtype,
        )


if __name__ == "__main__":
    key = jax.random.PRNGKey(0)
    k_x, k_w, k_b = jax.random.split(key, 3)

    batch = 8
    input_dim = 32
    output_dim = 16

    x = jax.random.normal(k_x, (batch, input_dim), dtype=jnp.float32)
    # Deterministic init mimicking nn.Linear's uniform(-1/sqrt(in), 1/sqrt(in))
    bound = 1.0 / (input_dim ** 0.5)
    weight = jax.random.uniform(
        k_w, (output_dim, input_dim), dtype=jnp.float32, minval=-bound, maxval=bound
    )
    bias = jax.random.uniform(
        k_b, (output_dim,), dtype=jnp.float32, minval=-bound, maxval=bound
    )

    # Parameters padded / transposed once here (amortized across all calls).
    model = PallasLinear(weight, bias)

    y = model(x)
    jax.block_until_ready(y)

    # Sanity check against plain-JAX reference (== torch.nn.Linear forward)
    y_ref = x @ weight.T + bias
    assert y.shape == (batch, output_dim)
    assert jnp.allclose(y, y_ref, atol=1e-5), "mismatch vs reference"

    print("KERNEL_OK")
</pallas_src>

<mosaic_0001>
module attributes {stable_mosaic.version = 11 : i64} {
  func.func @_linear_kernel(%arg0: i32, %arg1: i32, %arg2: i32, %arg3: memref<8x128xf32, #tpu.memory_space<vmem>>, %arg4: memref<128x128xf32, #tpu.memory_space<vmem>>, %arg5: memref<1x128xf32, #tpu.memory_space<vmem>>, %arg6: memref<8x128xf32, #tpu.memory_space<vmem>>) attributes {dimension_semantics = [#tpu.dimension_semantics<parallel>, #tpu.dimension_semantics<parallel>, #tpu.dimension_semantics<arbitrary>], iteration_bounds = array<i64: 1, 1, 1>, scalar_prefetch = 0 : i64, scratch_operands = 0 : i64, tpu.core_type = #tpu.core_type<tc>, window_params = [{transform_indices = @transform_0, window_bounds = array<i64: 8, 128>}, {transform_indices = @transform_1, window_bounds = array<i64: 128, 128>}, {transform_indices = @transform_2, window_bounds = array<i64: 1, 128>}, {transform_indices = @transform_3, window_bounds = array<i64: 8, 128>}]} {
    %c0 = arith.constant 0 : index
    %c0_0 = arith.constant 0 : index
    %0 = vector.load %arg3[%c0, %c0_0] : memref<8x128xf32, #tpu.memory_space<vmem>>, vector<8x128xf32>
    %c0_1 = arith.constant 0 : index
    %c0_2 = arith.constant 0 : index
    %1 = vector.load %arg4[%c0_1, %c0_2] : memref<128x128xf32, #tpu.memory_space<vmem>>, vector<128x128xf32>
    %cst = arith.constant dense<0.000000e+00> : vector<8x128xf32>
    %2 = tpu.matmul %0, %1, %cst {dimension_numbers = #tpu.dot_dimension_numbers<[1], [0], [0], [1], [0, 0, 1, 1], [], []>} : vector<8x128xf32>, vector<128x128xf32>, vector<8x128xf32> -> vector<8x128xf32>
    %c0_i32 = arith.constant 0 : i32
    %3 = arith.cmpi eq, %arg2, %c0_i32 : i32
    %4 = arith.extui %3 : i1 to i32
    %c0_i32_3 = arith.constant 0 : i32
    %5 = arith.cmpi ne, %4, %c0_i32_3 : i32
    scf.if %5 {
      %c0_8 = arith.constant 0 : index
      %c0_9 = arith.constant 0 : index
      %12 = vector.load %arg6[%c0_8, %c0_9] : memref<8x128xf32, #tpu.memory_space<vmem>>, vector<8x128xf32>
      tpu.vector_store %arg6[%c0_8, %c0_9], %2 {strides = array<i32>} : memref<8x128xf32, #tpu.memory_space<vmem>>, vector<8x128xf32>,
    } else {
    }
    %c0_i32_4 = arith.constant 0 : i32
    %6 = arith.cmpi sgt, %arg2, %c0_i32_4 : i32
    %7 = arith.extui %6 : i1 to i32
    %c0_i32_5 = arith.constant 0 : i32
    %8 = arith.cmpi ne, %7, %c0_i32_5 : i32
    scf.if %8 {
      %c0_8 = arith.constant 0 : index
      %c0_9 = arith.constant 0 : index
      %12 = vector.load %arg6[%c0_8, %c0_9] : memref<8x128xf32, #tpu.memory_space<vmem>>, vector<8x128xf32>
      %13 = arith.addf %12, %2 : vector<8x128xf32>
      %c0_10 = arith.constant 0 : index
      %c0_11 = arith.constant 0 : index
      %14 = vector.load %arg6[%c0_10, %c0_11] : memref<8x128xf32, #tpu.memory_space<vmem>>, vector<8x128xf32>
      tpu.vector_store %arg6[%c0_10, %c0_11], %13 {strides = array<i32>} : memref<8x128xf32, #tpu.memory_space<vmem>>, vector<8x128xf32>,
    } else {
    }
    %c0_i32_6 = arith.constant 0 : i32
    %9 = arith.cmpi eq, %arg2, %c0_i32_6 : i32
    %10 = arith.extui %9 : i1 to i32
    %c0_i32_7 = arith.constant 0 : i32
    %11 = arith.cmpi ne, %10, %c0_i32_7 : i32
    scf.if %11 {
      %c0_8 = arith.constant 0 : index
      %c0_9 = arith.constant 0 : index
      %12 = vector.load %arg6[%c0_8, %c0_9] : memref<8x128xf32, #tpu.memory_space<vmem>>, vector<8x128xf32>
      %c0_10 = arith.constant 0 : index
      %c0_11 = arith.constant 0 : index
      %13 = vector.load %arg5[%c0_10, %c0_11] : memref<1x128xf32, #tpu.memory_space<vmem>>, vector<1x128xf32>
      %14 = vector.broadcast %13 : vector<1x128xf32> to vector<8x128xf32>
      %15 = arith.addf %12, %14 : vector<8x128xf32>
      %c0_12 = arith.constant 0 : index
      %c0_13 = arith.constant 0 : index
      %16 = vector.load %arg6[%c0_12, %c0_13] : memref<8x128xf32, #tpu.memory_space<vmem>>, vector<8x128xf32>
      tpu.vector_store %arg6[%c0_12, %c0_13], %15 {strides = array<i32>} : memref<8x128xf32, #tpu.memory_space<vmem>>, vector<8x128xf32>,
    } else {
    }
    return
  }
  func.func @transform_0(%arg0: i32, %arg1: i32, %arg2: i32) -> (i32, i32) {
    %c0_i32 = arith.constant 0 : i32
    return %arg0, %arg2 : i32, i32
  }
  func.func @transform_1(%arg0: i32, %arg1: i32, %arg2: i32) -> (i32, i32) {
    %c0_i32 = arith.constant 0 : i32
    return %arg2, %arg1 : i32, i32
  }
  func.func @transform_2(%arg0: i32, %arg1: i32, %arg2: i32) -> (i32, i32) {
    %c0_i32 = arith.constant 0 : i32
    %c0_i32_0 = arith.constant 0 : i32
    return %c0_i32, %arg1 : i32, i32
  }
  func.func @transform_3(%arg0: i32, %arg1: i32, %arg2: i32) -> (i32, i32) {
    %c0_i32 = arith.constant 0 : i32
    return %arg0, %arg1 : i32, i32
  }
}

</mosaic_0001>

<bundles_post_ra>
// kernel: _linear_apply.1
= control target key start
LH: loop header
LB: loop body
LE: loop exit
PB: predicated region body
PF: predicated region fallthrough
CT: control target
= control target key end

     0   :  { %8 = vsyncpa [#allocation3], 0  ;;  %s297_s0 = inlined_call_operand.vmem [shape: f32[8,128], index: 0, kind: input, shape index: {}]   ;;  %s298_s1 = inlined_call_operand.hbm [shape: f32[128,128], index: 1, kind: input, shape index: {}]   ;;  %s299_s2 = inlined_call_operand.vmem [shape: f32[1,128], index: 2, kind: input, shape index: {}]   ;;  %s300_s3 = inlined_call_operand.hbm [shape: f32[8,128], index: 3, kind: output, shape index: {}]  }
   0x1   :  { %9 = vsyncpa [#allocation4], 0  ;;  %s259_s12 = smov [#allocation2]  }
   0x2   :  { %s17_s13 = sshll.u32 %s259_s12, 4  ;;  %s18_s13 = int_to_ptr.vmem [resolvable:$true] %s17_s13 }
   0x3   :  { %s223_s14 = scalar_lea.vmem %s18_s13, 2048  ;;  %p228_p1 = scmp.lt.s32.totalorder %s18_s13, %s18_s13 }
   0x4   :  { %p224_p0 = scmp.ne.s32.totalorder %s18_s13, %s223_s14  ;;  %p229_p2 = scmp.lt.s32.totalorder %s223_s14, %s223_s14 }
   0x6   :  { %p230_p3 = por %p229_p2, %p228_p1 }
   0x8   :  { %p231_p4 = pnand %p230_p3, %p224_p0 }
   0xa   :  { %234 = shalt.err (!%p231_p4)
}
   0xb   :  { %s260_s15 = smov 128   ;;  %s261_s16 = smov 8  }
   0xc   :  { %23 = dma.hbm_to_vmem [thread:$0]  %s298_s1, 2048, %s18_s13, [#allocation3], %s260_s15, %s260_s15, %s261_s16  }
   0xd   :  { %255 = dma.done.wait [#allocation3], 2048  }
   0xe   :  { %256 = vsyncadd [#allocation3], 4294965248  ;;  %v262_v0 = vmov 0.0   ;;  %vm263_vm0 = vmmov 0   ;;  %v45_v1 = vld [vmem:[#allocation2 + $0x78] sm:$0xff]  ;;  %v44_v2 = vld [vmem:[#allocation2 + $0x70] sm:$0xff] }
   0xf   :  { %174 = vmatprep.subr.mxu0 %v262_v0  ;;  %206 = vmatprep.mubr.msk.f32.mxu0 %vm263_vm0, %v262_v0  ;;  %v43_v3 = vld [vmem:[#allocation2 + $0x68] sm:$0xff]  ;;  %v42_v4 = vld [vmem:[#allocation2 + $0x60] sm:$0xff]  ;;  %v41_v5 = vld [vmem:[#allocation2 + $0x58] sm:$0xff]  ;;  %s264_s22 = smov [#allocation5]  }
  0x10   :  { %175 = vmatpush3.msra.mxu0 %v45_v1  ;;  %v40_v6 = vld [vmem:[#allocation2 + $0x50] sm:$0xff]  ;;  %v39_v7 = vld [vmem:[#allocation2 + $0x48] sm:$0xff]  ;;  %v38_v8 = vld [vmem:[#allocation2 + $0x40] sm:$0xff]  ;;  %s147_s23 = sshll.u32 %s264_s22, 4  ;;  %s148_s23 = int_to_ptr.vmem [resolvable:$true] %s147_s23 }
  0x11   :  { %176 = vmatprep.subr.mxu0 %v262_v0  ;;  %v37_v9 = vld [vmem:[#allocation2 + $0x38] sm:$0xff]  ;;  %v36_v10 = vld [vmem:[#allocation2 + $0x30] sm:$0xff]  ;;  %v35_v11 = vld [vmem:[#allocation2 + $0x28] sm:$0xff]  ;;  %s235_s24 = scalar_lea.vmem %s148_s23, 128  ;;  %p240_p6 = scmp.lt.s32.totalorder %s148_s23, %s148_s23 }
  0x12   :  { %177 = vmatpush3.msra.mxu0 %v44_v2  ;;  %v34_v12 = vld [vmem:[#allocation2 + $0x20] sm:$0xff]  ;;  %v33_v13 = vld [vmem:[#allocation2 + $0x18] sm:$0xff]  ;;  %v32_v14 = vld [vmem:[#allocation2 + $0x10] sm:$0xff]  ;;  %p236_p5 = scmp.ne.s32.totalorder %s148_s23, %s235_s24  ;;  %p241_p7 = scmp.lt.s32.totalorder %s235_s24, %s235_s24 }
  0x13   :  { %178 = vmatprep.subr.mxu0 %v262_v0  ;;  %v31_v15 = vld [vmem:[#allocation2 + $0x8] sm:$0xff]  ;;  %v30_v16 = vld [vmem:[#allocation2] sm:$0xff] }
  0x14   :  { %179 = vmatpush3.msra.mxu0 %v43_v3  ;;  %v29_v17 = vld [vmem:[%s297_s0] sm:$0xff]  ;;  %p242_p8 = por %p241_p7, %p240_p6 }
  0x15   :  { %180 = vmatprep.subr.mxu0 %v262_v0  ;;  %v156_v18 = vld [vmem:[%s299_s2] ss:$0 sm:$0xff] }
  0x16   :  { %181 = vmatpush3.msra.mxu0 %v42_v4  ;;  %p243_p9 = pnand %p242_p8, %p236_p5 }
  0x17   :  { %182 = vmatprep.subr.mxu0 %v262_v0 }
  0x18   :  { %183 = vmatpush3.msra.mxu0 %v41_v5 }
  0x19   :  { %184 = vmatprep.subr.mxu0 %v262_v0 }
  0x1a   :  { %185 = vmatpush3.msra.mxu0 %v40_v6 }
  0x1b   :  { %186 = vmatprep.subr.mxu0 %v262_v0 }
  0x1c   :  { %187 = vmatpush3.msra.mxu0 %v39_v7 }
  0x1d   :  { %188 = vmatprep.subr.mxu0 %v262_v0 }
  0x1e   :  { %189 = vmatpush3.msra.mxu0 %v38_v8 }
  0x1f   :  { %190 = vmatprep.subr.mxu0 %v262_v0 }
  0x20   :  { %191 = vmatpush3.msra.mxu0 %v37_v9 }
  0x21   :  { %192 = vmatprep.subr.mxu0 %v262_v0 }
  0x22   :  { %193 = vmatpush3.msra.mxu0 %v36_v10 }
  0x23   :  { %194 = vmatprep.subr.mxu0 %v262_v0 }
  0x24   :  { %195 = vmatpush3.msra.mxu0 %v35_v11 }
  0x25   :  { %196 = vmatprep.subr.mxu0 %v262_v0 }
  0x26   :  { %197 = vmatpush3.msra.mxu0 %v34_v12 }
  0x27   :  { %198 = vmatprep.subr.mxu0 %v262_v0 }
  0x28   :  { %199 = vmatpush3.msra.mxu0 %v33_v13 }
  0x29   :  { %200 = vmatprep.subr.mxu0 %v262_v0 }
  0x2a   :  { %201 = vmatpush3.msra.mxu0 %v32_v14 }
  0x2b   :  { %202 = vmatprep.subr.mxu0 %v262_v0 }
  0x2c   :  { %203 = vmatpush3.msra.mxu0 %v31_v15 }
  0x2d   :  { %204 = vmatprep.subr.mxu0 %v262_v0 }
  0x2e   :  { %205 = vmatpush3.msra.mxu0 %v30_v16 }
  0x2f   :  { %207 = vmatmul.mubr.f32.vlgmr.msra.gmra.mxu0 %v29_v17 }
  0xef   :  { %v112_v19 = vpop.f32.mrf.mxu0 }
  0xf0   :  { %v139_v20 = vadd.f32 %v156_v18, %v112_v19 }
  0xf1   :  { %v208_v21 = vpop.f32.mrf.mxu0 }
  0xf2   :  { %140 = vst [vmem:[#allocation5] sm:$0xff] %v139_v20 }
  0xf3   :  { %246 = shalt.err (!%p243_p9)
}
  0xf4   :  { %150 = dma.vmem_to_hbm [thread:$0]  %s148_s23, 128, %s300_s3, [#allocation4]  }
  0xf5   :  { %257 = dma.done.wait [#allocation4], 128  }
  0xf6   :  { %258 = vsyncadd [#allocation4], 4294967168 }
  0xf7   :  { %154 = vsyncpa [#allocation3], 1 }
  0xf8   :  { %155 = vsyncpa [#allocation4], 1 }

</bundles_post_ra>
